<compile_context>
chip_gen: v7x
topology: tpu7x:2x2x1
jax: 0.10.0
libtpu: 0.0.40
codegen_flags: <defaults>
</compile_context>

<pallas_src>
import functools

import jax
import jax.numpy as jnp
from jax.experimental import pallas as pl
from jax.experimental.pallas import tpu as pltpu  # noqa: F401  (TPU backend)

BN_EPS = 1e-5
LANE = 128
SUBLANE = 8


def _round_up(n, m):
    return ((n + m - 1) // m) * m


# ------------------------------ Pallas kernel ------------------------------ #

def _mlp_fused_kernel(*refs, n_layers, out_widths):
    """Entire MLP in one kernel; activations never leave VMEM/vregs."""
    x_ref = refs[0]
    w_refs = refs[1:1 + n_layers]
    b_ref = refs[1 + n_layers]          # packed (8, max_width) f32 bias block
    o_ref = refs[2 + n_layers]

    h = x_ref[...]                                       # bf16 [Bp, F0p]
    for i in range(n_layers):
        w = out_widths[i]
        # MXU matmul in bf16, f32 accumulation.
        z = jnp.dot(h, w_refs[i][...], preferred_element_type=jnp.float32)
        z = z + b_ref[i:i + 1, :w]                       # f32 bias (static slice)
        if i < n_layers - 1:
            # BatchNorm already folded into W/b; Dropout = identity (eval).
            h = jnp.maximum(z, 0.0).astype(jnp.bfloat16)
        else:
            h = z                                        # final logits, f32
    o_ref[...] = h


# ------------------------------ model setup -------------------------------- #

def init_mlp_params(key, input_size, hidden_sizes, num_classes):
    """Mirrors MLP.__init__ / init_weights: W ~ U(0,1), b = 0, BN identity.

    Weights are stored as [in_features, out_features] (transpose of PyTorch's
    nn.Linear layout) so the kernel computes x @ W + b directly.
    """
    params = []
    in_features = input_size
    for hidden_size in hidden_sizes:
        key, sub = jax.random.split(key)
        w = jax.random.uniform(sub, (in_features, hidden_size),
                               dtype=jnp.float32, minval=0.0, maxval=1.0)
        b = jnp.zeros((hidden_size,), jnp.float32)
        gamma = jnp.ones((hidden_size,), jnp.float32)
        beta = jnp.zeros((hidden_size,), jnp.float32)
        mean = jnp.zeros((hidden_size,), jnp.float32)
        var = jnp.ones((hidden_size,), jnp.float32)
        params.append(("hidden", (w, b, gamma, beta, mean, var)))
        in_features = hidden_size
    key, sub = jax.random.split(key)
    w_out = jax.random.uniform(sub, (in_features, num_classes),
                               dtype=jnp.float32, minval=0.0, maxval=1.0)
    b_out = jnp.zeros((num_classes,), jnp.float32)
    params.append(("out", (w_out, b_out)))
    return params


def build_fused_mlp(params):
    """Fold eval-mode BN into W/b, pad to lane-dense shapes, pack biases."""
    folded = []
    for kind, p in params:
        if kind == "hidden":
            w, b, gamma, beta, mean, var = p
            scale = gamma * jax.lax.rsqrt(var + BN_EPS)
            w = w * scale[None, :]
            b = (b - mean) * scale + beta
        else:
            w, b = p
        folded.append((w, b))

    n_layers = len(folded)
    in_dims = [folded[0][0].shape[0]] + [w.shape[1] for w, _ in folded[:-1]]
    out_dims = [w.shape[1] for w, _ in folded]
    in_p = [_round_up(d, LANE) for d in in_dims]
    out_p = [_round_up(d, LANE) for d in out_dims]

    # Zero-pad weights to multiples of 128 on both dims; padded rows/cols
    # contribute exact zeros so the math is unchanged.  Pre-cast to bf16.
    w_pads = []
    for (w, _), ip, op in zip(folded, in_p, out_p):
        wp = jnp.zeros((ip, op), jnp.float32).at[:w.shape[0], :w.shape[1]].set(w)
        w_pads.append(wp.astype(jnp.bfloat16))

    # Pack all biases into a single (8, max_width) f32 block (one DMA).
    max_w = max(out_p)
    b_rows = _round_up(n_layers, SUBLANE)
    b_pack = jnp.zeros((b_rows, max_w), jnp.float32)
    for i, (_, b) in enumerate(folded):
        b_pack = b_pack.at[i, :b.shape[0]].set(b)

    return {
        "w_pads": w_pads,
        "b_pack": b_pack,
        "in_p": tuple(in_p),
        "out_p": tuple(out_p),
        "in_dim": in_dims[0],
        "num_classes": out_dims[-1],
    }


# ------------------------------ host wrapper -------------------------------- #

def mlp_forward_fused(fused, x):
    w_pads = fused["w_pads"]
    b_pack = fused["b_pack"]
    in_p = fused["in_p"]
    out_p = fused["out_p"]
    n_layers = len(w_pads)

    B, F = x.shape
    Bp = _round_up(B, SUBLANE)
    xp = jnp.zeros((Bp, in_p[0]), jnp.float32).at[:B, :F].set(x)
    xp = xp.astype(jnp.bfloat16)

    full = lambda shp: pl.BlockSpec(shp, lambda: (0, 0))
    kernel = functools.partial(_mlp_fused_kernel, n_layers=n_layers,
                               out_widths=out_p)

    out = pl.pallas_call(
        kernel,
        out_shape=jax.ShapeDtypeStruct((Bp, out_p[-1]), jnp.float32),
        in_specs=[full((Bp, in_p[0]))]
                 + [full(w.shape) for w in w_pads]
                 + [full(b_pack.shape)],
        out_specs=full((Bp, out_p[-1])),
    )(xp, *w_pads, b_pack)

    return out[:B, :fused["num_classes"]]


# --------------------------------- main ------------------------------------ #

if __name__ == "__main__":
    input_size = 32
    hidden_sizes = [64, 32]
    num_classes = 8
    batch = 8

    key = jax.random.PRNGKey(0)
    key, xkey = jax.random.split(key)
    x = jax.random.normal(xkey, (batch, input_size), dtype=jnp.float32)

    params = init_mlp_params(key, input_size, hidden_sizes, num_classes)
    fused = build_fused_mlp(params)

    out = mlp_forward_fused(fused, x)
    out = jax.block_until_ready(out)
    assert out.shape == (batch, num_classes)
    assert bool(jnp.all(jnp.isfinite(out)))
    print("KERNEL_OK")
</pallas_src>

<mosaic_0001>
module attributes {stable_mosaic.version = 11 : i64} {
  func.func @_mlp_fused_kernel(%arg0: memref<8x128xbf16, #tpu.memory_space<vmem>>, %arg1: memref<128x128xbf16, #tpu.memory_space<vmem>>, %arg2: memref<128x128xbf16, #tpu.memory_space<vmem>>, %arg3: memref<128x128xbf16, #tpu.memory_space<vmem>>, %arg4: memref<8x128xf32, #tpu.memory_space<vmem>>, %arg5: memref<8x128xf32, #tpu.memory_space<vmem>>) attributes {dimension_semantics = [], scalar_prefetch = 0 : i64, scratch_operands = 0 : i64, tpu.core_type = #tpu.core_type<tc>} {
    %c0 = arith.constant 0 : index
    %c0_0 = arith.constant 0 : index
    %0 = vector.load %arg0[%c0, %c0_0] : memref<8x128xbf16, #tpu.memory_space<vmem>>, vector<8x128xbf16>
    %c0_1 = arith.constant 0 : index
    %c0_2 = arith.constant 0 : index
    %1 = vector.load %arg1[%c0_1, %c0_2] : memref<128x128xbf16, #tpu.memory_space<vmem>>, vector<128x128xbf16>
    %cst = arith.constant dense<0.000000e+00> : vector<8x128xf32>
    %2 = tpu.matmul %0, %1, %cst {dimension_numbers = #tpu.dot_dimension_numbers<[1], [0], [0], [1], [0, 0, 1, 1], [], []>} : vector<8x128xbf16>, vector<128x128xbf16>, vector<8x128xf32> -> vector<8x128xf32>
    %c0_3 = arith.constant 0 : index
    %c0_4 = arith.constant 0 : index
    %3 = vector.load %arg4[%c0_3, %c0_4] : memref<8x128xf32, #tpu.memory_space<vmem>>, vector<1x128xf32>
    %4 = vector.broadcast %3 : vector<1x128xf32> to vector<8x128xf32>
    %5 = arith.addf %2, %4 : vector<8x128xf32>
    %cst_5 = arith.constant 0.000000e+00 : f32
    %6 = vector.broadcast %cst_5 : f32 to vector<8x128xf32>
    %7 = arith.maximumf %5, %6 : vector<8x128xf32>
    %8 = arith.truncf %7 : vector<8x128xf32> to vector<8x128xbf16>
    %c0_6 = arith.constant 0 : index
    %c0_7 = arith.constant 0 : index
    %9 = vector.load %arg2[%c0_6, %c0_7] : memref<128x128xbf16, #tpu.memory_space<vmem>>, vector<128x128xbf16>
    %cst_8 = arith.constant dense<0.000000e+00> : vector<8x128xf32>
    %10 = tpu.matmul %8, %9, %cst_8 {dimension_numbers = #tpu.dot_dimension_numbers<[1], [0], [0], [1], [0, 0, 1, 1], [], []>} : vector<8x128xbf16>, vector<128x128xbf16>, vector<8x128xf32> -> vector<8x128xf32>
    %c1 = arith.constant 1 : index
    %c0_9 = arith.constant 0 : index
    %11 = vector.load %arg4[%c1, %c0_9] : memref<8x128xf32, #tpu.memory_space<vmem>>, vector<1x128xf32>
    %12 = vector.broadcast %11 : vector<1x128xf32> to vector<8x128xf32>
    %13 = arith.addf %10, %12 : vector<8x128xf32>
    %cst_10 = arith.constant 0.000000e+00 : f32
    %14 = vector.broadcast %cst_10 : f32 to vector<8x128xf32>
    %15 = arith.maximumf %13, %14 : vector<8x128xf32>
    %16 = arith.truncf %15 : vector<8x128xf32> to vector<8x128xbf16>
    %c0_11 = arith.constant 0 : index
    %c0_12 = arith.constant 0 : index
    %17 = vector.load %arg3[%c0_11, %c0_12] : memref<128x128xbf16, #tpu.memory_space<vmem>>, vector<128x128xbf16>
    %cst_13 = arith.constant dense<0.000000e+00> : vector<8x128xf32>
    %18 = tpu.matmul %16, %17, %cst_13 {dimension_numbers = #tpu.dot_dimension_numbers<[1], [0], [0], [1], [0, 0, 1, 1], [], []>} : vector<8x128xbf16>, vector<128x128xbf16>, vector<8x128xf32> -> vector<8x128xf32>
    %c2 = arith.constant 2 : index
    %c0_14 = arith.constant 0 : index
    %19 = vector.load %arg4[%c2, %c0_14] : memref<8x128xf32, #tpu.memory_space<vmem>>, vector<1x128xf32>
    %20 = vector.broadcast %19 : vector<1x128xf32> to vector<8x128xf32>
    %21 = arith.addf %18, %20 : vector<8x128xf32>
    %c0_15 = arith.constant 0 : index
    %c0_16 = arith.constant 0 : index
    %22 = vector.load %arg5[%c0_15, %c0_16] : memref<8x128xf32, #tpu.memory_space<vmem>>, vector<8x128xf32>
    tpu.vector_store %arg5[%c0_15, %c0_16], %21 {strides = array<i32>} : memref<8x128xf32, #tpu.memory_space<vmem>>, vector<8x128xf32>,
    return
  }
}

</mosaic_0001>

<bundles_post_ra>
// kernel: tpu_custom_call.1
= control target key start
LH: loop header
LB: loop body
LE: loop exit
PB: predicated region body
PF: predicated region fallthrough
CT: control target
= control target key end

     0   :  { %10 = vsyncpa [#allocation3], 0  ;;  %s837_s0 = inlined_call_operand.hbm [shape: bf16[8,128], index: 0, kind: input, shape index: {}]   ;;  %s838_s1 = inlined_call_operand.hbm [shape: bf16[128,128], index: 1, kind: input, shape index: {}]   ;;  %s839_s2 = inlined_call_operand.hbm [shape: bf16[128,128], index: 2, kind: input, shape index: {}]   ;;  %s840_s3 = inlined_call_operand.hbm [shape: bf16[128,128], index: 3, kind: input, shape index: {}]   ;;  %s841_s4 = inlined_call_operand.vmem [shape: f32[8,128], index: 4, kind: input, shape index: {}]   ;;  %s842_s5 = inlined_call_operand.hbm [shape: f32[8,128], index: 5, kind: output, shape index: {}]  }
   0x1   :  { %11 = vsyncpa [#allocation6], 0 }
   0x2   :  { %12 = vsyncpa [#allocation9], 0 }
   0x3   :  { %13 = vsyncpa [#allocation4], 0  ;;  %s690_s18 = smov [#allocation5]   ;;  %s572_s22 = scalar_lea.hbm %s838_s1, 1024 }
   0x4   :  { %s29_s19 = sshll.u32 %s690_s18, 4  ;;  %p573_p0 = scmp.ne.s32.totalorder %s838_s1, %s572_s22  ;;  %s30_s19 = int_to_ptr.vmem [resolvable:$true] %s29_s19 }
   0x5   :  { %p576_p1 = scmp.lt.u32.totalorder %s572_s22, %s838_s1 }
   0x7   :  { %p578_p2 = pnand %p576_p1, %p573_p0 }
   0x9   :  { %581 = shalt.err (!%p578_p2)
}
   0xa   :  { %s582_s27 = scalar_lea.vmem %s30_s19, 1024  ;;  %p587_p4 = scmp.lt.s32.totalorder %s30_s19, %s30_s19 }
   0xb   :  { %p583_p3 = scmp.ne.s32.totalorder %s30_s19, %s582_s27  ;;  %p588_p5 = scmp.lt.s32.totalorder %s582_s27, %s582_s27 }
   0xd   :  { %p589_p6 = por %p588_p5, %p587_p4 }
   0xf   :  { %p590_p7 = pnand %p589_p6, %p583_p3 }
  0x11   :  { %593 = shalt.err (!%p590_p7)
}
  0x12   :  { %s691_s28 = smov 64   ;;  %s692_s29 = smov 4  }
  0x13   :  { %35 = dma.hbm_to_vmem [thread:$0]  %s838_s1, 1024, %s30_s19, [#allocation6], %s691_s28, %s691_s28, %s692_s29  }
  0x14   :  { %s693_s7 = smov [#allocation2]   ;;  %s694_s9 = smov [#allocation7]  }
  0x15   :  { %s20_s8 = sshll.u32 %s693_s7, 4  ;;  %s41_s10 = sshll.u32 %s694_s9, 4  ;;  %s21_s8 = int_to_ptr.vmem [resolvable:$true] %s20_s8  ;;  %s42_s10 = int_to_ptr.vmem [resolvable:$true] %s41_s10 }
  0x16   :  { %s594_s13 = scalar_lea.hbm %s837_s0, 64 }
  0x17   :  { %p595_p8 = scmp.ne.s32.totalorder %s837_s0, %s594_s13  ;;  %p598_p9 = scmp.lt.u32.totalorder %s594_s13, %s837_s0 }
  0x19   :  { %p600_p10 = pnand %p598_p9, %p595_p8 }
  0x1b   :  { %603 = shalt.err (!%p600_p10)
}
  0x1c   :  { %s604_s1 = scalar_lea.vmem %s21_s8, 64  ;;  %p609_p12 = scmp.lt.s32.totalorder %s21_s8, %s21_s8 }
  0x1d   :  { %p605_p11 = scmp.ne.s32.totalorder %s21_s8, %s604_s1  ;;  %p610_p13 = scmp.lt.s32.totalorder %s604_s1, %s604_s1 }
  0x1f   :  { %p611_p0 = por %p610_p13, %p609_p12 }
  0x21   :  { %p612_p1 = pnand %p611_p0, %p605_p11 }
  0x23   :  { %615 = shalt.err (!%p612_p1)
}
  0x24   :  { %23 = dma.hbm_to_vmem [thread:$0]  %s837_s0, 64, %s21_s8, [#allocation3]  }
  0x25   :  { %s616_s22 = scalar_lea.hbm %s839_s2, 1024 }
  0x26   :  { %p617_p2 = scmp.ne.s32.totalorder %s839_s2, %s616_s22  ;;  %p620_p3 = scmp.lt.u32.totalorder %s616_s22, %s839_s2 }
  0x28   :  { %p622_p4 = pnand %p620_p3, %p617_p2 }
  0x2a   :  { %625 = shalt.err (!%p622_p4)
}
  0x2b   :  { %s626_s27 = scalar_lea.vmem %s42_s10, 1024  ;;  %p631_p6 = scmp.lt.s32.totalorder %s42_s10, %s42_s10 }
  0x2c   :  { %p627_p5 = scmp.ne.s32.totalorder %s42_s10, %s626_s27  ;;  %p632_p7 = scmp.lt.s32.totalorder %s626_s27, %s626_s27 }
  0x2e   :  { %p633_p8 = por %p632_p7, %p631_p6 }
  0x30   :  { %p634_p9 = pnand %p633_p8, %p627_p5 }
  0x32   :  { %637 = shalt.err (!%p634_p9)
}
  0x33   :  { %47 = dma.hbm_to_vmem [thread:$0]  %s839_s2, 1024, %s42_s10, [#allocation6], %s691_s28, %s691_s28, %s692_s29  }
  0x34   :  { %s695_s6 = smov [#allocation8]   ;;  %s638_s11 = scalar_lea.hbm %s840_s3, 1024 }
  0x35   :  { %s53_s7 = sshll.u32 %s695_s6, 4  ;;  %p639_p10 = scmp.ne.s32.totalorder %s840_s3, %s638_s11  ;;  %s54_s7 = int_to_ptr.vmem [resolvable:$true] %s53_s7 }
  0x36   :  { %p642_p11 = scmp.lt.u32.totalorder %s638_s11, %s840_s3 }
  0x38   :  { %p644_p12 = pnand %p642_p11, %p639_p10 }
  0x3a   :  { %647 = shalt.err (!%p644_p12)
}
  0x3b   :  { %s648_s16 = scalar_lea.vmem %s54_s7, 1024  ;;  %p653_p0 = scmp.lt.s32.totalorder %s54_s7, %s54_s7 }
  0x3c   :  { %p649_p13 = scmp.ne.s32.totalorder %s54_s7, %s648_s16  ;;  %p654_p1 = scmp.lt.s32.totalorder %s648_s16, %s648_s16 }
  0x3e   :  { %p655_p2 = por %p654_p1, %p653_p0 }
  0x40   :  { %p656_p3 = pnand %p655_p2, %p649_p13 }
  0x42   :  { %659 = shalt.err (!%p656_p3)
}
  0x43   :  { %59 = dma.hbm_to_vmem [thread:$0]  %s840_s3, 1024, %s54_s7, [#allocation9], %s691_s28, %s691_s28, %s692_s29  }
  0x44   :  { %682 = dma.done.wait [#allocation3], 64  }
  0x45   :  { %683 = vsyncadd [#allocation3], 4294967232 }
  0x46   :  { %684 = dma.done.wait [#allocation6], 2048  }
  0x47   :  { %685 = vsyncadd [#allocation6], 4294965248 }
  0x48   :  { %686 = dma.done.wait [#allocation9], 1024  }
  0x49   :  { %687 = vsyncadd [#allocation9], 4294966272  ;;  %v696_v0 = vmov 0.0   ;;  %vm697_vm0 = vmmov 0   ;;  %v548_v1 = vld [vmem:[#allocation5] sm:$0xff]   ;;  %v549_v2 = vld [vmem:[#allocation5 + $0x8] sm:$0xff]  }
  0x4a   :  { %479 = vmatprep.subr.bf16.mxu0 %v696_v0  ;;  %495 = vmatprep.mubr.msk.bf16.mxu0 %vm697_vm0, %v696_v0  ;;  %v550_v3 = vld [vmem:[#allocation5 + $0x10] sm:$0xff]   ;;  %v556_v4 = vld [vmem:[#allocation7] sm:$0xff]   ;;  %v551_v5 = vld [vmem:[#allocation5 + $0x18] sm:$0xff]   ;;  %s698_s19 = smov [#allocation10]  }
  0x4b   :  { %499 = vmatprep.subr.bf16.mxu1 %v696_v0  ;;  %515 = vmatprep.mubr.msk.bf16.mxu1 %vm697_vm0, %v696_v0  ;;  %v557_v6 = vld [vmem:[#allocation7 + $0x8] sm:$0xff]   ;;  %v552_v7 = vld [vmem:[#allocation5 + $0x20] sm:$0xff]   ;;  %v558_v8 = vld [vmem:[#allocation7 + $0x10] sm:$0xff]   ;;  %s414_s20 = sshll.u32 %s698_s19, 4  ;;  %s415_s20 = int_to_ptr.vmem [resolvable:$true] %s414_s20 }
  0x4c   :  { %480 = vmatpush3.bf16.msra.mxu0 %v548_v1  ;;  %500 = vmatpush3.bf16.msra.mxu1 %v556_v4  ;;  %v553_v9 = vld [vmem:[#allocation5 + $0x28] sm:$0xff]   ;;  %v559_v10 = vld [vmem:[#allocation7 + $0x18] sm:$0xff]   ;;  %v554_v11 = vld [vmem:[#allocation5 + $0x30] sm:$0xff]   ;;  %s660_s21 = scalar_lea.vmem %s415_s20, 128  ;;  %p665_p5 = scmp.lt.s32.totalorder %s415_s20, %s415_s20 }
  0x4d   :  { %481 = vmatprep.subr.bf16.mxu0 %v696_v0  ;;  %501 = vmatprep.subr.bf16.mxu1 %v696_v0  ;;  %v560_v12 = vld [vmem:[#allocation7 + $0x20] sm:$0xff]   ;;  %v555_v13 = vld [vmem:[#allocation5 + $0x38] sm:$0xff]   ;;  %v561_v14 = vld [vmem:[#allocation7 + $0x28] sm:$0xff]   ;;  %p661_p4 = scmp.ne.s32.totalorder %s415_s20, %s660_s21  ;;  %p666_p6 = scmp.lt.s32.totalorder %s660_s21, %s660_s21 }
  0x4e   :  { %v75_v15 = vld [vmem:[#allocation2] sm:$0xf]  ;;  %v562_v16 = vld [vmem:[#allocation7 + $0x30] sm:$0xff]   ;;  %v564_v18 = vld [vmem:[#allocation8] sm:$0xff]  }
  0x4f   :  { %v563_v17 = vld [vmem:[#allocation7 + $0x38] sm:$0xff]   ;;  %v565_v19 = vld [vmem:[#allocation8 + $0x8] sm:$0xff]   ;;  %v566_v20 = vld [vmem:[#allocation8 + $0x10] sm:$0xff]   ;;  %p667_p7 = por %p666_p6, %p665_p5 }
  0x50   :  { %482 = vmatpush3.bf16.msra.mxu0 %v549_v2  ;;  %502 = vmatpush3.bf16.msra.mxu1 %v557_v6  ;;  %v567_v21 = vld [vmem:[#allocation8 + $0x18] sm:$0xff]   ;;  %v568_v22 = vld [vmem:[#allocation8 + $0x20] sm:$0xff]   ;;  %v569_v23 = vld [vmem:[#allocation8 + $0x28] sm:$0xff]  }
  0x51   :  { %483 = vmatprep.subr.bf16.mxu0 %v696_v0  ;;  %503 = vmatprep.subr.bf16.mxu1 %v696_v0  ;;  %v425_v24 = vld [vmem:[%s841_s4] ss:$0 sm:$0xff]  ;;  %v571_v33 = vld [vmem:[#allocation8 + $0x38] sm:$0xff]   ;;  %v434_v34 = vld [vmem:[%s841_s4 + $0x1] ss:$0 sm:$0xff]  ;;  %p668_p8 = pnand %p667_p7, %p661_p4 }
  0x52   :  { %v570_v32 = vld [vmem:[#allocation8 + $0x30] sm:$0xff]  }
  0x53   :  { %v443_v42 = vld [vmem:[%s841_s4 + $0x2] ss:$0 sm:$0xff] }
  0x54   :  { %484 = vmatpush3.bf16.msra.mxu0 %v550_v3  ;;  %504 = vmatpush3.bf16.msra.mxu1 %v558_v8 }
  0x55   :  { %485 = vmatprep.subr.bf16.mxu0 %v696_v0  ;;  %505 = vmatprep.subr.bf16.mxu1 %v696_v0 }
  0x58   :  { %486 = vmatpush3.bf16.msra.mxu0 %v551_v5  ;;  %506 = vmatpush3.bf16.msra.mxu1 %v559_v10 }
  0x59   :  { %487 = vmatprep.subr.bf16.mxu0 %v696_v0  ;;  %507 = vmatprep.subr.bf16.mxu1 %v696_v0 }
  0x5c   :  { %488 = vmatpush3.bf16.msra.mxu0 %v552_v7  ;;  %508 = vmatpush3.bf16.msra.mxu1 %v560_v12 }
  0x5d   :  { %489 = vmatprep.subr.bf16.mxu0 %v696_v0  ;;  %509 = vmatprep.subr.bf16.mxu1 %v696_v0 }
  0x60   :  { %490 = vmatpush3.bf16.msra.mxu0 %v553_v9  ;;  %510 = vmatpush3.bf16.msra.mxu1 %v561_v14 }
  0x61   :  { %491 = vmatprep.subr.bf16.mxu0 %v696_v0  ;;  %511 = vmatprep.subr.bf16.mxu1 %v696_v0 }
  0x64   :  { %492 = vmatpush3.bf16.msra.mxu0 %v554_v11  ;;  %512 = vmatpush3.bf16.msra.mxu1 %v562_v16 }
  0x65   :  { %493 = vmatprep.subr.bf16.mxu0 %v696_v0  ;;  %513 = vmatprep.subr.bf16.mxu1 %v696_v0 }
  0x68   :  { %494 = vmatpush3.bf16.msra.mxu0 %v555_v13  ;;  %514 = vmatpush3.bf16.msra.mxu1 %v563_v17 }
  0x69   :  { %519 = vmatprep.subr.bf16.mxu0 %v696_v0 }
  0x6b   :  { %496 = vmatmul.mubr.bf16.vlgmr.msra.gmra.mrb[0].mxu0 %v75_v15 }
  0x6c   :  { %535 = vmatprep.mubr.msk.bf16.mxu0 %vm697_vm0, %v696_v0  ;;  %520 = vmatpush3.bf16.msra.mxu0 %v564_v18 }
  0x6d   :  { %521 = vmatprep.subr.bf16.mxu0 %v696_v0 }
  0x70   :  { %522 = vmatpush3.bf16.msra.mxu0 %v565_v19 }
  0x71   :  { %523 = vmatprep.subr.bf16.mxu0 %v696_v0 }
  0x74   :  { %524 = vmatpush3.bf16.msra.mxu0 %v566_v20 }
  0x75   :  { %525 = vmatprep.subr.bf16.mxu0 %v696_v0 }
  0x78   :  { %526 = vmatpush3.bf16.msra.mxu0 %v567_v21 }
  0x79   :  { %527 = vmatprep.subr.bf16.mxu0 %v696_v0 }
  0x7c   :  { %528 = vmatpush3.bf16.msra.mxu0 %v568_v22 }
  0x7d   :  { %529 = vmatprep.subr.bf16.mxu0 %v696_v0 }
  0x80   :  { %530 = vmatpush3.bf16.msra.mxu0 %v569_v23 }
  0x81   :  { %531 = vmatprep.subr.bf16.mxu0 %v696_v0 }
  0x84   :  { %532 = vmatpush3.bf16.msra.mxu0 %v570_v32 }
  0x85   :  { %533 = vmatprep.subr.bf16.mxu0 %v696_v0 }
  0x88   :  { %534 = vmatpush3.bf16.msra.mxu0 %v571_v33 }
 0x13e   :  { %v179_v25 = vpop.f32.mrb[0].mxu0 }
 0x13f   :  { %v180_v26 = vadd.f32 %v425_v24, %v179_v25  ;;  %v497_v27 = vpop.f32.mrb[1].mxu0 }
 0x140   :  { %v182_v28 = vpop.f32.mrb[2].mxu0 }
 0x141   :  { %v185_v29 = vmax.f32 %v180_v26, 0.0  ;;  %v498_v30 = vpop.f32.mrb[3].mxu0 }
 0x143   :  { %v186_v31 = vpack.c.bf16 %v185_v29, %v185_v29 }
 0x145   :  { %516 = vmatmul.mubr.bf16.vlgmr.msra.gmra.mrb[0].mxu1 %v186_v31 }
 0x218   :  { %v290_v35 = vpop.f32.mrb[0].mxu1 }
 0x219   :  { %v291_v36 = vadd.f32 %v434_v34, %v290_v35  ;;  %v517_v37 = vpop.f32.mrb[1].mxu1 }
 0x21a   :  { %v293_v38 = vpop.f32.mrb[2].mxu1 }
 0x21b   :  { %v296_v39 = vmax.f32 %v291_v36, 0.0  ;;  %v518_v40 = vpop.f32.mrb[3].mxu1 }
 0x21d   :  { %v297_v41 = vpack.c.bf16 %v296_v39, %v296_v39 }
 0x21f   :  { %536 = vmatmul.mubr.bf16.vlgmr.msra.gmra.mrb[4].mxu0 %v297_v41 }
 0x2f2   :  { %v401_v43 = vpop.f32.mrb[4].mxu0 }
 0x2f3   :  { %v402_v44 = vadd.f32 %v443_v42, %v401_v43  ;;  %v537_v45 = vpop.f32.mrb[5].mxu0 }
 0x2f4   :  { %v404_v46 = vpop.f32.mrb[6].mxu0 }
 0x2f5   :  { %407 = vst [vmem:[#allocation10] sm:$0xff] %v402_v44  ;;  %v538_v47 = vpop.f32.mrb[7].mxu0 }
 0x2f6   :  { %671 = shalt.err (!%p668_p8)
}
 0x2f7   :  { %s672_s4 = scalar_lea.hbm %s842_s5, 128 }
 0x2f8   :  { %p673_p9 = scmp.ne.s32.totalorder %s842_s5, %s672_s4  ;;  %p676_p10 = scmp.lt.u32.totalorder %s672_s4, %s842_s5 }
 0x2fa   :  { %p678_p11 = pnand %p676_p10, %p673_p9 }
 0x2fc   :  { %681 = shalt.err (!%p678_p11)
}
 0x2fd   :  { %417 = dma.vmem_to_hbm [thread:$0]  %s415_s20, 128, %s842_s5, [#allocation4]  }
 0x2fe   :  { %688 = dma.done.wait [#allocation4], 128  }
 0x2ff   :  { %689 = vsyncadd [#allocation4], 4294967168 }
 0x300   :  { %421 = vsyncpa [#allocation3], 1 }
 0x301   :  { %422 = vsyncpa [#allocation6], 1 }
 0x302   :  { %423 = vsyncpa [#allocation9], 1 }
 0x303   :  { %424 = vsyncpa [#allocation4], 1 }

</bundles_post_ra>
